<compile_context>
chip_gen: v6e
topology: v6e:2x2x1
jax: 0.10.0
libtpu: 0.0.40
codegen_flags: <defaults>
</compile_context>

<pallas_src>
import math

import jax
import jax.numpy as jnp
import numpy as np
from jax.experimental import pallas as pl
from jax.experimental.pallas import tpu as pltpu


def _rope_kernel(q_ref, k_ref, cos_ref, sin_ref, qo_ref, ko_ref):
    # Block shapes: q/k/out -> (R, C), tables -> (1, C); C is a multiple of D,
    # so real/imag pairs never straddle a block boundary.
    C = q_ref.shape[-1]
    cos = cos_ref[...]            # (1, C) f32
    sin = sin_ref[...]            # (1, C) f32, sign: -sin on even lanes, +sin on odd

    lane = jax.lax.broadcasted_iota(jnp.int32, q_ref.shape, 1)
    is_even = (lane & 1) == 0

    def rotate(x_ref, o_ref):
        x = x_ref[...].astype(jnp.float32)
        # Pair partner via non-negative lane rolls (XLU):
        #   even lane j needs x[j+1]  -> roll by C-1
        #   odd  lane j needs x[j-1]  -> roll by 1
        # (wrapped values only land on lanes where they are not selected).
        x_next = pltpu.roll(x, shift=C - 1, axis=1)
        x_prev = pltpu.roll(x, shift=1, axis=1)
        partner = jnp.where(is_even, x_next, x_prev)
        o_ref[...] = (x * cos + partner * sin).astype(o_ref.dtype)

    rotate(q_ref, qo_ref)   # q rotated & stored first ...
    rotate(k_ref, ko_ref)   # ... k only loaded afterwards (lower vreg pressure)


def apply_rope_pallas(q, k, offset, max_period: float = 10000.0,
                      time_before_heads: bool = False,
                      block_bytes: int = 1 << 20):
    """JAX/Pallas equivalent of moshi's apply_rope.

    q, k: [B, T, H, D] if time_before_heads else [B, H, T, D]
    offset: scalar (or shape-(1,)) integer array.
    Returns (q_rot, k_rot) with the same shape/dtype as the inputs.
    """
    if time_before_heads:
        # Glue only: the kernel works on the [B, H, T, D] layout.
        q = jnp.transpose(q, (0, 2, 1, 3))
        k = jnp.transpose(k, (0, 2, 1, 3))

    B, H, T, D = q.shape
    assert k.shape == q.shape
    assert D > 0 and D % 2 == 0
    assert max_period > 0

    # ---- cos / parity-signed sin tables (computed once, outside the kernel) ----
    half = jnp.arange(D // 2, dtype=jnp.float32)
    freqs = jnp.exp(half * (-math.log(max_period) * 2.0 / D))            # (D//2,)
    off = jnp.asarray(offset).astype(jnp.float32).reshape(-1)[0]
    ts = off + jnp.arange(T, dtype=jnp.float32)                          # (T,)
    angle = ts[:, None] * freqs[None, :]                                 # (T, D//2)
    cos_t = jnp.repeat(jnp.cos(angle), 2, axis=1)                        # (T, D)
    sign = jnp.tile(jnp.array([-1.0, 1.0], dtype=jnp.float32), D // 2)   # (D,)
    sin_t = jnp.repeat(jnp.sin(angle), 2, axis=1) * sign                 # (T, D)
    cos_flat = cos_t.reshape(1, T * D)
    sin_flat = sin_t.reshape(1, T * D)

    # ---- flatten to a lane-dense 2-D problem ----
    rows, cols = B * H, T * D
    q2 = q.reshape(rows, cols)
    k2 = k.reshape(rows, cols)

    itemsize = jnp.dtype(q.dtype).itemsize
    if cols * itemsize <= block_bytes:
        col_tile = cols
    else:
        # Column tile: multiple of D (pair alignment) and of 128 (lane density).
        unit = (D * 128) // math.gcd(D, 128)
        col_tile = min(cols, max(unit, (block_bytes // (itemsize * unit)) * unit))

    sub = 16 if itemsize == 2 else 8           # sublane packing (bf16 vs f32)
    row_tile = max(1, block_bytes // (col_tile * itemsize))
    if row_tile >= rows:
        row_tile = rows
    else:
        row_tile = min(rows, max(sub, (row_tile // sub) * sub))

    n_row_blocks = pl.cdiv(rows, row_tile)
    n_col_blocks = pl.cdiv(cols, col_tile)
    # Column axis OUTER: cos/sin block index is constant across the inner row
    # axis, so the table DMA is skipped for all but the first row block.
    grid = (n_col_blocks, n_row_blocks)
    qk_spec = pl.BlockSpec((row_tile, col_tile), lambda j, i: (i, j))
    tbl_spec = pl.BlockSpec((1, col_tile), lambda j, i: (0, j))

    cost = pl.CostEstimate(
        flops=6 * rows * cols,
        transcendentals=0,
        bytes_accessed=4 * rows * cols * itemsize + 2 * cols * 4,
    )

    qo2, ko2 = pl.pallas_call(
        _rope_kernel,
        out_shape=(jax.ShapeDtypeStruct((rows, cols), q.dtype),
                   jax.ShapeDtypeStruct((rows, cols), k.dtype)),
        grid=grid,
        in_specs=[qk_spec, qk_spec, tbl_spec, tbl_spec],
        out_specs=(qk_spec, qk_spec),
        compiler_params=pltpu.CompilerParams(
            dimension_semantics=("parallel", "parallel"),
            vmem_limit_bytes=32 * 1024 * 1024),
        cost_estimate=cost,
    )(q2, k2, cos_flat, sin_flat)

    qo = qo2.reshape(B, H, T, D)
    ko = ko2.reshape(B, H, T, D)
    if time_before_heads:
        qo = jnp.transpose(qo, (0, 2, 1, 3))
        ko = jnp.transpose(ko, (0, 2, 1, 3))
    return qo, ko


class RotaryEmbedding:
    """RoPE module mirroring the PyTorch RotaryEmbedding (no parameters)."""

    def __init__(self, max_period: float = 10000.0):
        self.max_period = max_period

    def __call__(self, q, k, offset, time_before_heads: bool = False):
        return apply_rope_pallas(q, k, offset, self.max_period, time_before_heads)


def _apply_rope_ref(q, k, offset, max_period=10000.0):
    """Pure-JAX reference matching the PyTorch semantics ([B, H, T, D])."""
    B, H, T, D = q.shape
    ds = jnp.arange(D // 2, dtype=jnp.float32)
    freqs = jnp.exp(ds * (-math.log(max_period) * 2.0 / D))
    ts = jnp.asarray(offset).astype(jnp.float32).reshape(-1)[0] + jnp.arange(T, dtype=jnp.float32)
    ts = ts.reshape(1, -1, 1)  # broadcast over (T, D//2)
    qv = q.reshape(B, H, T, D // 2, 2).astype(jnp.float32)
    kv = k.reshape(B, H, T, D // 2, 2).astype(jnp.float32)
    rotr = jnp.cos(freqs * ts)
    roti = jnp.sin(freqs * ts)
    qr, qi = qv[..., 0], qv[..., 1]
    kr, ki = kv[..., 0], kv[..., 1]
    qo = jnp.stack([qr * rotr - qi * roti, qr * roti + qi * rotr], axis=-1)
    ko = jnp.stack([kr * rotr - ki * roti, kr * roti + ki * rotr], axis=-1)
    return qo.reshape(B, H, T, D).astype(q.dtype), ko.reshape(B, H, T, D).astype(k.dtype)


if __name__ == "__main__":
    key = jax.random.PRNGKey(0)
    kq, kk, kq2, kk2 = jax.random.split(key, 4)

    # --- small default-layout test ([B, H, T, D], time_before_heads=False) ---
    B, H, T, D = 2, 4, 8, 32
    q = jax.random.normal(kq, (B, H, T, D), dtype=jnp.float32)
    k = jax.random.normal(kk, (B, H, T, D), dtype=jnp.float32)
    offset = jnp.array([3], dtype=jnp.int32)

    rope = RotaryEmbedding(max_period=10000.0)
    qo, ko = rope(q, k, offset)
    jax.block_until_ready((qo, ko))

    qo_ref, ko_ref = _apply_rope_ref(q, k, offset)
    np.testing.assert_allclose(np.asarray(qo), np.asarray(qo_ref), rtol=1e-5, atol=1e-5)
    np.testing.assert_allclose(np.asarray(ko), np.asarray(ko_ref), rtol=1e-5, atol=1e-5)

    # --- time_before_heads=True layout ([B, T, H, D]) ---
    q_t = jnp.transpose(q, (0, 2, 1, 3))
    k_t = jnp.transpose(k, (0, 2, 1, 3))
    qo_t, ko_t = rope(q_t, k_t, offset, time_before_heads=True)
    jax.block_until_ready((qo_t, ko_t))
    np.testing.assert_allclose(np.asarray(jnp.transpose(qo_t, (0, 2, 1, 3))),
                               np.asarray(qo_ref), rtol=1e-5, atol=1e-5)
    np.testing.assert_allclose(np.asarray(jnp.transpose(ko_t, (0, 2, 1, 3))),
                               np.asarray(ko_ref), rtol=1e-5, atol=1e-5)

    # --- tiled path: small block_bytes forces multiple column/row blocks ---
    B2, H2, T2, D2 = 2, 4, 64, 128
    q_big = jax.random.normal(kq2, (B2, H2, T2, D2), dtype=jnp.float32)
    k_big = jax.random.normal(kk2, (B2, H2, T2, D2), dtype=jnp.float32)
    off2 = jnp.array([17], dtype=jnp.int32)
    qo_b, ko_b = apply_rope_pallas(q_big, k_big, off2, block_bytes=1 << 14)
    jax.block_until_ready((qo_b, ko_b))
    qo_b_ref, ko_b_ref = _apply_rope_ref(q_big, k_big, off2)
    np.testing.assert_allclose(np.asarray(qo_b), np.asarray(qo_b_ref), rtol=1e-5, atol=1e-5)
    np.testing.assert_allclose(np.asarray(ko_b), np.asarray(ko_b_ref), rtol=1e-5, atol=1e-5)

    print("KERNEL_OK")
</pallas_src>

<mosaic_0001>
module attributes {stable_mosaic.version = 11 : i64} {
  func.func @_rope_kernel(%arg0: i32, %arg1: i32, %arg2: memref<8x256xf32, #tpu.memory_space<vmem>>, %arg3: memref<8x256xf32, #tpu.memory_space<vmem>>, %arg4: memref<1x256xf32, #tpu.memory_space<vmem>>, %arg5: memref<1x256xf32, #tpu.memory_space<vmem>>, %arg6: memref<8x256xf32, #tpu.memory_space<vmem>>, %arg7: memref<8x256xf32, #tpu.memory_space<vmem>>) attributes {dimension_semantics = [#tpu.dimension_semantics<parallel>, #tpu.dimension_semantics<parallel>], iteration_bounds = array<i64: 1, 1>, scalar_prefetch = 0 : i64, scratch_operands = 0 : i64, tpu.core_type = #tpu.core_type<tc>, window_params = [{transform_indices = @transform_0, window_bounds = array<i64: 8, 256>}, {transform_indices = @transform_1, window_bounds = array<i64: 8, 256>}, {transform_indices = @transform_2, window_bounds = array<i64: 1, 256>}, {transform_indices = @transform_3, window_bounds = array<i64: 1, 256>}, {transform_indices = @transform_4, window_bounds = array<i64: 8, 256>}, {transform_indices = @transform_5, window_bounds = array<i64: 8, 256>}]} {
    %c0 = arith.constant 0 : index
    %c0_0 = arith.constant 0 : index
    %0 = vector.load %arg4[%c0, %c0_0] : memref<1x256xf32, #tpu.memory_space<vmem>>, vector<1x256xf32>
    %c0_1 = arith.constant 0 : index
    %c0_2 = arith.constant 0 : index
    %1 = vector.load %arg5[%c0_1, %c0_2] : memref<1x256xf32, #tpu.memory_space<vmem>>, vector<1x256xf32>
    %2 = tpu.iota {dimensions = array<i32: 1>} : vector<8x256xi32>
    %c1_i32 = arith.constant 1 : i32
    %3 = vector.broadcast %c1_i32 : i32 to vector<8x256xi32>
    %4 = arith.andi %2, %3 : vector<8x256xi32>
    %c0_i32 = arith.constant 0 : i32
    %5 = vector.broadcast %c0_i32 : i32 to vector<8x256xi32>
    %6 = arith.cmpi eq, %4, %5 : vector<8x256xi32>
    %c0_3 = arith.constant 0 : index
    %c0_4 = arith.constant 0 : index
    %7 = vector.load %arg2[%c0_3, %c0_4] : memref<8x256xf32, #tpu.memory_space<vmem>>, vector<8x256xf32>
    %c255_i32 = arith.constant 255 : i32
    %8 = tpu.dynamic_rotate %7 by %c255_i32 dim 1 : vector<8x256xf32>, i32 -> vector<8x256xf32>
    %c1_i32_5 = arith.constant 1 : i32
    %9 = tpu.dynamic_rotate %7 by %c1_i32_5 dim 1 : vector<8x256xf32>, i32 -> vector<8x256xf32>
    %10 = arith.select %6, %8, %9 : vector<8x256xi1>, vector<8x256xf32>
    %11 = vector.broadcast %0 : vector<1x256xf32> to vector<8x256xf32>
    %12 = arith.mulf %7, %11 : vector<8x256xf32>
    %13 = vector.broadcast %1 : vector<1x256xf32> to vector<8x256xf32>
    %14 = arith.mulf %10, %13 : vector<8x256xf32>
    %15 = arith.addf %12, %14 : vector<8x256xf32>
    %c0_6 = arith.constant 0 : index
    %c0_7 = arith.constant 0 : index
    %16 = vector.load %arg6[%c0_6, %c0_7] : memref<8x256xf32, #tpu.memory_space<vmem>>, vector<8x256xf32>
    tpu.vector_store %arg6[%c0_6, %c0_7], %15 {strides = array<i32>} : memref<8x256xf32, #tpu.memory_space<vmem>>, vector<8x256xf32>,
    %c0_8 = arith.constant 0 : index
    %c0_9 = arith.constant 0 : index
    %17 = vector.load %arg3[%c0_8, %c0_9] : memref<8x256xf32, #tpu.memory_space<vmem>>, vector<8x256xf32>
    %c255_i32_10 = arith.constant 255 : i32
    %18 = tpu.dynamic_rotate %17 by %c255_i32_10 dim 1 : vector<8x256xf32>, i32 -> vector<8x256xf32>
    %c1_i32_11 = arith.constant 1 : i32
    %19 = tpu.dynamic_rotate %17 by %c1_i32_11 dim 1 : vector<8x256xf32>, i32 -> vector<8x256xf32>
    %20 = arith.select %6, %18, %19 : vector<8x256xi1>, vector<8x256xf32>
    %21 = vector.broadcast %0 : vector<1x256xf32> to vector<8x256xf32>
    %22 = arith.mulf %17, %21 : vector<8x256xf32>
    %23 = vector.broadcast %1 : vector<1x256xf32> to vector<8x256xf32>
    %24 = arith.mulf %20, %23 : vector<8x256xf32>
    %25 = arith.addf %22, %24 : vector<8x256xf32>
    %c0_12 = arith.constant 0 : index
    %c0_13 = arith.constant 0 : index
    %26 = vector.load %arg7[%c0_12, %c0_13] : memref<8x256xf32, #tpu.memory_space<vmem>>, vector<8x256xf32>
    tpu.vector_store %arg7[%c0_12, %c0_13], %25 {strides = array<i32>} : memref<8x256xf32, #tpu.memory_space<vmem>>, vector<8x256xf32>,
    return
  }
  func.func @transform_0(%arg0: i32, %arg1: i32) -> (i32, i32) {
    %c0_i32 = arith.constant 0 : i32
    return %arg1, %arg0 : i32, i32
  }
  func.func @transform_1(%arg0: i32, %arg1: i32) -> (i32, i32) {
    %c0_i32 = arith.constant 0 : i32
    return %arg1, %arg0 : i32, i32
  }
  func.func @transform_2(%arg0: i32, %arg1: i32) -> (i32, i32) {
    %c0_i32 = arith.constant 0 : i32
    %c0_i32_0 = arith.constant 0 : i32
    return %c0_i32, %arg0 : i32, i32
  }
  func.func @transform_3(%arg0: i32, %arg1: i32) -> (i32, i32) {
    %c0_i32 = arith.constant 0 : i32
    %c0_i32_0 = arith.constant 0 : i32
    return %c0_i32, %arg0 : i32, i32
  }
  func.func @transform_4(%arg0: i32, %arg1: i32) -> (i32, i32) {
    %c0_i32 = arith.constant 0 : i32
    return %arg1, %arg0 : i32, i32
  }
  func.func @transform_5(%arg0: i32, %arg1: i32) -> (i32, i32) {
    %c0_i32 = arith.constant 0 : i32
    return %arg1, %arg0 : i32, i32
  }
}

</mosaic_0001>

<bundles_post_ra>
// kernel: tpu_custom_call.1
= control target key start
LH: loop header
LB: loop body
LE: loop exit
PB: predicated region body
PF: predicated region fallthrough
CT: control target
= control target key end

     0   :  { %11 = vsyncpa [#allocation3], 0  ;;  %s328_s0 = inlined_call_operand.hbm [shape: f32[8,256], index: 0, kind: input, shape index: {}]   ;;  %s329_s1 = inlined_call_operand.hbm [shape: f32[8,256], index: 1, kind: input, shape index: {}]   ;;  %s330_s2 = inlined_call_operand.vmem [shape: f32[1,256], index: 2, kind: input, shape index: {}]   ;;  %s331_s3 = inlined_call_operand.vmem [shape: f32[1,256], index: 3, kind: input, shape index: {}]   ;;  %s332_s4 = inlined_call_operand.hbm [shape: f32[8,256], index: 4, kind: output, shape index: {0}]   ;;  %s333_s5 = inlined_call_operand.hbm [shape: f32[8,256], index: 5, kind: output, shape index: {1}]  }
   0x1   :  { %12 = vsyncpa [#allocation6], 0 }
   0x2   :  { %13 = vsyncpa [#allocation4], 0 }
   0x3   :  { %14 = vsyncpa [#allocation9], 0  ;;  %s250_s18 = smov [#allocation2]   ;;  %s251_s20 = smov [#allocation5]  }
   0x4   :  { %s21_s19 = sshll.u32 %s250_s18, 4  ;;  %s31_s21 = sshll.u32 %s251_s20, 4  ;;  %s22_s19 = int_to_ptr.vmem [resolvable:$true] %s21_s19  ;;  %s32_s21 = int_to_ptr.vmem [resolvable:$true] %s31_s21 }
   0x5   :  { %s170_s22 = scalar_lea.vmem %s22_s19, 256  ;;  %p175_p1 = scmp.lt.s32.totalorder %s22_s19, %s22_s19 }
   0x6   :  { %p171_p0 = scmp.ne.s32.totalorder %s22_s19, %s170_s22  ;;  %p176_p2 = scmp.lt.s32.totalorder %s170_s22, %s170_s22 }
   0x8   :  { %p177_p3 = por %p176_p2, %p175_p1 }
   0xa   :  { %p178_p4 = pnand %p177_p3, %p171_p0 }
   0xc   :  { %181 = shalt.err (!%p178_p4)
}
   0xd   :  { %24 = dma.hbm_to_vmem [thread:$0]  %s328_s0, 256, %s22_s19, [#allocation3]  }
   0xe   :  { %s190_s25 = scalar_lea.vmem %s32_s21, 256  ;;  %p195_p6 = scmp.lt.s32.totalorder %s32_s21, %s32_s21 }
   0xf   :  { %p191_p5 = scmp.ne.s32.totalorder %s32_s21, %s190_s25  ;;  %p196_p7 = scmp.lt.s32.totalorder %s190_s25, %s190_s25 }
  0x11   :  { %p197_p8 = por %p196_p7, %p195_p6 }
  0x13   :  { %p198_p9 = pnand %p197_p8, %p191_p5 }
  0x15   :  { %201 = shalt.err (!%p198_p9)
}
  0x16   :  { %34 = dma.hbm_to_vmem [thread:$0]  %s329_s1, 256, %s32_s21, [#allocation6]  }
  0x17   :  { %242 = dma.done.wait [#allocation3], 256  }
  0x18   :  { %243 = vsyncadd [#allocation3], 4294967040 }
  0x19   :  { %244 = dma.done.wait [#allocation6], 256  }
  0x1a   :  { %245 = vsyncadd [#allocation6], 4294967040  ;;  %v54_v0 = vld [vmem:[#allocation2] sm:$0xff]  ;;  %s252_s28 = smov 1   ;;  %s253_s29 = smov 127   ;;  %v55_v1 = vld [vmem:[#allocation2 + $0x8] sm:$0xff]  ;;  %v47_v4 = vlaneseq }
  0x1b   :  { %63 = vrot.lane.b32.xlu1 %v54_v0, %s252_s28  ;;  %56 = vrot.lane.b32.xlu0 %v54_v0, %s253_s29  ;;  %v103_v2 = vld [vmem:[#allocation5 + $0x8] sm:$0xff]  ;;  %v102_v3 = vld [vmem:[#allocation5] sm:$0xff]  ;;  %v45_v10 = vld [vmem:[%s330_s2] sm:$0x3]  ;;  %s254_s2 = smov [#allocation7]  }
  0x1c   :  { %v48_v5 = vand.u32 127, %v47_v4  ;;  %v74_v6 = vshrl.u32 %v47_v4, 7  ;;  %v46_v17 = vld [vmem:[%s331_s3] sm:$0x3]  ;;  %s132_s3 = sshll.u32 %s254_s2, 4  ;;  %s133_s3 = int_to_ptr.vmem [resolvable:$true] %s132_s3 }
  0x1d   :  { %s202_s7 = scalar_lea.vmem %s133_s3, 256  ;;  %p207_p11 = scmp.lt.s32.totalorder %s133_s3, %s133_s3 }
  0x1e   :  { %v49_v7 = vadd.s32 128, %v48_v5  ;;  %v75_v8 = vsub.s32 0, %v74_v6  ;;  %v79_v9 = vsub.s32 1, %v74_v6  ;;  %v50_v11 = vand.u32 1, %v48_v5  ;;  %p203_p10 = scmp.ne.s32.totalorder %s133_s3, %s202_s7  ;;  %p208_p12 = scmp.lt.s32.totalorder %s202_s7, %s202_s7 }
  0x1f   :  { %65 = vrot.lane.b32.xlu1 %v55_v1, %s252_s28  ;;  %58 = vrot.lane.b32.xlu0 %v55_v1, %s253_s29  ;;  %vm67_vm0 = vcmp.lt.s32.totalorder %v48_v5, 1  ;;  %vm60_vm1 = vcmp.lt.s32.totalorder %v48_v5, 127 }
  0x20   :  { %v51_v12 = vand.u32 1, %v49_v7  ;;  %v76_v13 = vrot.slane %v45_v10, %v75_v8  ;;  %v80_v14 = vrot.slane %v45_v10, %v79_v9  ;;  %vm298_vm2 = vcmp.eq.s32.totalorder %v50_v11, 0  ;;  %p209_p13 = por %p208_p12, %p207_p11 }
  0x21   :  { %v89_v20 = vrot.slane %v46_v17, %v75_v8  ;;  %v93_v21 = vrot.slane %v46_v17, %v79_v9 }
  0x22   :  { %vm302_vm3 = vcmp.eq.s32.totalorder %v51_v12, 0  ;;  %v83_v22 = vmul.f32 %v76_v13, %v54_v0  ;;  %v84_v23 = vmul.f32 %v80_v14, %v55_v1  ;;  %v119_v38 = vmul.f32 %v103_v2, %v80_v14  ;;  %p210_p0 = pnand %p209_p13, %p203_p10 }
  0x23   :  { %106 = vrot.lane.b32.xlu1 %v103_v2, %s253_s29  ;;  %104 = vrot.lane.b32.xlu0 %v102_v3, %s253_s29  ;;  %v118_v39 = vmul.f32 %v102_v3, %v76_v13 }
  0x27   :  { %112 = vrot.lane.b32.xlu1 %v103_v2, %s252_s28  ;;  %110 = vrot.lane.b32.xlu0 %v102_v3, %s252_s28 }
  0x8d   :  { %v64_v15 = vpop.permute.xlu1 %63  ;;  %v57_v16 = vpop.permute.xlu0 %56 }
  0x91   :  { %v66_v24 = vpop.permute.xlu1 %65  ;;  %v59_v25 = vpop.permute.xlu0 %58 }
  0x92   :  { %v68_v26 = vsel %vm67_vm0, %v64_v15, %v66_v24  ;;  %v69_v27 = vsel %vm67_vm0, %v66_v24, %v64_v15  ;;  %v61_v28 = vsel %vm60_vm1, %v57_v16, %v59_v25  ;;  %v62_v29 = vsel %vm60_vm1, %v59_v25, %v57_v16 }
  0x93   :  { %v70_v30 = vsel %vm298_vm2, %v61_v28, %v69_v27  ;;  %v71_v31 = vsel %vm302_vm3, %v62_v29, %v68_v26 }
  0x94   :  { %v96_v32 = vmul.f32 %v89_v20, %v70_v30  ;;  %v97_v33 = vmul.f32 %v93_v21, %v71_v31 }
  0x95   :  { %v107_v34 = vpop.permute.xlu1 %106  ;;  %v105_v35 = vpop.permute.xlu0 %104 }
  0x96   :  { %v98_v36 = vadd.f32 %v96_v32, %v83_v22  ;;  %v99_v37 = vadd.f32 %v97_v33, %v84_v23 }
  0x98   :  { %100 = vst [vmem:[#allocation7] sm:$0xff] %v98_v36  ;;  %101 = vst [vmem:[#allocation7 + $0x8] sm:$0xff] %v99_v37 }
  0x99   :  { %v113_v40 = vpop.permute.xlu1 %112  ;;  %v111_v41 = vpop.permute.xlu0 %110 }
  0x9a   :  { %213 = shalt.err (!%p210_p0)
}
  0x9b   :  { %135 = dma.vmem_to_hbm [thread:$0]  %s133_s3, 256, %s332_s4, [#allocation4]   ;;  %v108_v42 = vsel %vm60_vm1, %v105_v35, %v107_v34  ;;  %v109_v43 = vsel %vm60_vm1, %v107_v34, %v105_v35  ;;  %v114_v44 = vsel %vm67_vm0, %v111_v41, %v113_v40  ;;  %v115_v45 = vsel %vm67_vm0, %v113_v40, %v111_v41 }
  0x9c   :  { %v116_v46 = vsel %vm298_vm2, %v108_v42, %v115_v45  ;;  %v117_v47 = vsel %vm302_vm3, %v109_v43, %v114_v44  ;;  %s255_s10 = smov [#allocation8]  }
  0x9d   :  { %s142_s11 = sshll.u32 %s255_s10, 4  ;;  %v120_v48 = vmul.f32 %v116_v46, %v89_v20  ;;  %v121_v49 = vmul.f32 %v117_v47, %v93_v21  ;;  %s143_s11 = int_to_ptr.vmem [resolvable:$true] %s142_s11 }
  0x9e   :  { %s222_s4 = scalar_lea.vmem %s143_s11, 256  ;;  %p227_p2 = scmp.lt.s32.totalorder %s143_s11, %s143_s11 }
  0x9f   :  { %v122_v50 = vadd.f32 %v120_v48, %v118_v39  ;;  %v123_v51 = vadd.f32 %v121_v49, %v119_v38  ;;  %p223_p1 = scmp.ne.s32.totalorder %s143_s11, %s222_s4  ;;  %p228_p3 = scmp.lt.s32.totalorder %s222_s4, %s222_s4 }
  0xa1   :  { %124 = vst [vmem:[#allocation8] sm:$0xff] %v122_v50  ;;  %125 = vst [vmem:[#allocation8 + $0x8] sm:$0xff] %v123_v51  ;;  %p229_p4 = por %p228_p3, %p227_p2 }
  0xa3   :  { %p230_p5 = pnand %p229_p4, %p223_p1 }
  0xa5   :  { %233 = shalt.err (!%p230_p5)
}
  0xa6   :  { %145 = dma.vmem_to_hbm [thread:$0]  %s143_s11, 256, %s333_s5, [#allocation9]  }
  0xa7   :  { %246 = dma.done.wait [#allocation4], 256  }
  0xa8   :  { %247 = vsyncadd [#allocation4], 4294967040 }
  0xa9   :  { %248 = dma.done.wait [#allocation9], 256  }
  0xaa   :  { %249 = vsyncadd [#allocation9], 4294967040 }
  0xab   :  { %152 = vsyncpa [#allocation3], 1 }
  0xac   :  { %153 = vsyncpa [#allocation6], 1 }
  0xad   :  { %154 = vsyncpa [#allocation4], 1 }
  0xae   :  { %155 = vsyncpa [#allocation9], 1 }

</bundles_post_ra>
